<compile_context>
chip_gen: v7x
topology: tpu7x:2x2x1
jax: 0.10.0
libtpu: 0.0.40
codegen_flags: <defaults>
</compile_context>

<pallas_src>
import functools

import jax
import jax.numpy as jnp
from jax import lax
from jax.experimental import pallas as pl
from jax.experimental.pallas import tpu as pltpu


def _cond_entropy_kernel(x_ref, out_ref, *, n_rows, needs_mask):
    # x_ref: (TR, C) logits block in VMEM; out_ref: (1, 1, 128) lane-dense partial sum.
    tr = x_ref.shape[0]

    x = x_ref[...].astype(jnp.float32)             # per-tile upcast (bf16 callers halve HBM bytes)

    # Numerically-stable per-row "entropy" term:
    #   sum_c softmax * log_softmax = sum(e*z)/s - log(s),
    #   with z = x - max(x), e = exp(z), s = sum(e).
    m = jnp.max(x, axis=1, keepdims=True)           # (TR, 1)   XLU
    z = x - m                                       # (TR, C)   VPU
    e = jnp.exp(z)                                  # (TR, C)   EUP
    s = jnp.sum(e, axis=1, keepdims=True)           # (TR, 1)   XLU
    sez = jnp.sum(e * z, axis=1, keepdims=True)     # (TR, 1)   XLU
    per_row = sez / s - jnp.log(s)                  # (TR, 1)   exact divide (tiny)

    if needs_mask:
        # Only the (TR, 1) per-row mask is needed: any garbage in padded rows
        # stays confined to those rows and is zeroed here. No full-tile mask.
        base = pl.program_id(0) * tr
        row = base + lax.broadcasted_iota(jnp.int32, (tr, 1), 0)
        per_row = jnp.where(row < n_rows, per_row, 0.0)

    tile_sum = jnp.sum(per_row)                     # scalar partial for this tile
    out_ref[...] = jnp.broadcast_to(tile_sum, out_ref.shape).astype(out_ref.dtype)


def _vmem_capacity_bytes():
    """Per-generation VMEM capacity (v5e/v6e: 128 MiB, v7x: 64 MiB per TC)."""
    try:
        return int(pltpu.get_tpu_info().vmem_capacity_bytes)
    except Exception:
        return 64 << 20      # v7x per-TC size: safe lower bound on every generation


def _pick_tile_rows(n, c, itemsize, budget_bytes, align):
    """C-aware batch-tile size from a byte budget (~3 MiB input block)."""
    target_block_bytes = 3 << 20
    tr = max(align, target_block_bytes // max(1, c * itemsize))
    # Shrink until double-buffered input + ~5 f32 (tr, C) intermediates fit VMEM budget.
    while tr > align and (2 * tr * c * itemsize + 5 * tr * c * 4) > budget_bytes:
        tr //= 2
    tr = max(align, (tr // align) * align)
    if tr >= n:
        if n >= 2 * align:
            # Guarantee >= 2 grid tiles so both v7x TensorCores get work.
            tr = max(align, ((n // 2) // align) * align)
        else:
            tr = n                                  # single full-batch tile (always legal)
    return tr


def conditional_entropy_loss(x, *, tile_rows=None):
    """x: (N, C) logits (f32 / bf16 / ...). Returns scalar float32 loss.

    On memory-bound chips (v5e especially), pass bf16 logits: the kernel
    upcasts per tile in VMEM, so HBM traffic — the binding resource — halves.
    """
    n, c = x.shape
    itemsize = x.dtype.itemsize
    align = max(8, 32 // max(1, itemsize))          # 8 (f32) / 16 (bf16) / 32 (int8, fp8)

    vmem_cap = _vmem_capacity_bytes()
    budget = (vmem_cap * 3) // 4                    # headroom for compiler internal scratch

    if tile_rows is None:
        tr = _pick_tile_rows(n, c, itemsize, budget, align)
    else:
        tr = min(int(tile_rows), n)
        if tr != n:
            tr = max(align, (tr // align) * align)

    num_tiles = pl.cdiv(n, tr)
    needs_mask = (num_tiles * tr != n)

    # Triple-buffer tiny input blocks when there are enough grid steps to pipeline.
    use_buffered = (
        num_tiles >= 3
        and tr * c * itemsize < (512 << 10)
        and hasattr(pl, "Buffered")
    )
    n_bufs = 3 if use_buffered else 2

    vmem_need = n_bufs * tr * c * itemsize + 5 * tr * c * 4 + (2 << 20)
    vmem_limit = int(min(max(vmem_need, 16 << 20), budget))

    kernel = functools.partial(_cond_entropy_kernel, n_rows=n, needs_mask=needs_mask)
    index_map = lambda i: (i, 0)

    def _run(in_spec):
        return pl.pallas_call(
            kernel,
            out_shape=jax.ShapeDtypeStruct((num_tiles, 1, 128), jnp.float32),
            grid_spec=pltpu.PrefetchScalarGridSpec(
                num_scalar_prefetch=0,
                grid=(num_tiles,),
                in_specs=[in_spec],
                out_specs=pl.BlockSpec((1, 1, 128), lambda i: (i, 0, 0)),
            ),
            compiler_params=pltpu.CompilerParams(
                dimension_semantics=("parallel",),   # v7x: shard batch tiles across both TCs
                vmem_limit_bytes=vmem_limit,
            ),
        )(x)

    if use_buffered:
        try:
            partials = _run(pl.BlockSpec((tr, c), index_map, pipeline_mode=pl.Buffered(3)))
        except Exception:
            # Fall back to default double-buffering if Buffered is unavailable here.
            partials = _run(pl.BlockSpec((tr, c), index_map))
    else:
        partials = _run(pl.BlockSpec((tr, c), index_map))

    # Tiny finalize in XLA: sum per-tile partials, multiply by 1/N, negate.
    return -jnp.sum(partials[:, 0, 0]) * (1.0 / n)


def _reference(x):
    # pure-JAX reference of the PyTorch forward
    xf = x.astype(jnp.float32)
    b = jax.nn.softmax(xf, axis=1) * jax.nn.log_softmax(xf, axis=1)
    b = b.sum(axis=1)
    return -1.0 * b.mean(axis=0)


if __name__ == "__main__":
    root = jax.random.PRNGKey(0)
    k0, k1 = jax.random.split(root)

    # 1) primary small test: batch=8, classes=32 (single-tile path)
    x = jax.random.normal(k0, (8, 32), dtype=jnp.float32)
    loss = conditional_entropy_loss(x)
    jax.block_until_ready(loss)
    ref = _reference(x)
    assert jnp.allclose(loss, ref, atol=1e-4, rtol=1e-4), (loss, ref)

    # 2) tiled + masked path: N=20 with forced 8-row tiles (last tile partially valid)
    x2 = jax.random.normal(k1, (20, 32), dtype=jnp.float32)
    loss2 = conditional_entropy_loss(x2, tile_rows=8)
    jax.block_until_ready(loss2)
    ref2 = _reference(x2)
    assert jnp.allclose(loss2, ref2, atol=1e-4, rtol=1e-4), (loss2, ref2)

    # 3) automatic C-aware tile selection on the same masked shape
    loss2b = conditional_entropy_loss(x2)
    jax.block_until_ready(loss2b)
    assert jnp.allclose(loss2b, ref2, atol=1e-4, rtol=1e-4), (loss2b, ref2)

    # 4) native bf16 logits (upcast happens per tile inside the kernel)
    x3 = x.astype(jnp.bfloat16)
    loss3 = conditional_entropy_loss(x3)
    jax.block_until_ready(loss3)
    ref3 = _reference(x3)
    assert jnp.allclose(loss3, ref3, atol=1e-4, rtol=1e-4), (loss3, ref3)

    print("KERNEL_OK")
</pallas_src>

<mosaic_0001>
module attributes {stable_mosaic.version = 11 : i64} {
  func.func @_cond_entropy_kernel(%arg0: i32, %arg1: memref<8x32xf32, #tpu.memory_space<vmem>>, %arg2: memref<1x1x128xf32, #tpu.memory_space<vmem>>) attributes {dimension_semantics = [#tpu.dimension_semantics<parallel>], iteration_bounds = array<i64: 1>, scalar_prefetch = 0 : i64, scratch_operands = 0 : i64, tpu.core_type = #tpu.core_type<tc>, window_params = [{transform_indices = @transform_0, window_bounds = array<i64: 8, 32>}, {transform_indices = @transform_1, window_bounds = array<i64: 1, 1, 128>}]} {
    %c0 = arith.constant 0 : index
    %c0_0 = arith.constant 0 : index
    %0 = vector.load %arg1[%c0, %c0_0] : memref<8x32xf32, #tpu.memory_space<vmem>>, vector<8x32xf32>
    %cst = arith.constant dense<0xFF800000> : vector<8xf32>
    %1 = vector.multi_reduction <maximumf>, %0, %cst [1] : vector<8x32xf32> to vector<8xf32>
    %2 = vector.shape_cast %1 : vector<8xf32> to vector<8x1xf32>
    %3 = vector.broadcast %2 : vector<8x1xf32> to vector<8x32xf32>
    %4 = arith.subf %0, %3 : vector<8x32xf32>
    %5 = math.exp %4 : vector<8x32xf32>
    %cst_1 = arith.constant dense<0.000000e+00> : vector<8xf32>
    %6 = vector.multi_reduction <add>, %5, %cst_1 [1] : vector<8x32xf32> to vector<8xf32>
    %7 = vector.shape_cast %6 : vector<8xf32> to vector<8x1xf32>
    %8 = arith.mulf %5, %4 : vector<8x32xf32>
    %cst_2 = arith.constant dense<0.000000e+00> : vector<8xf32>
    %9 = vector.multi_reduction <add>, %8, %cst_2 [1] : vector<8x32xf32> to vector<8xf32>
    %10 = vector.shape_cast %9 : vector<8xf32> to vector<8x1xf32>
    %11 = arith.divf %10, %7 : vector<8x1xf32>
    %12 = math.log %7 : vector<8x1xf32>
    %13 = arith.subf %11, %12 : vector<8x1xf32>
    %14 = vector.shape_cast %13 : vector<8x1xf32> to vector<1x8x1xf32>
    %cst_3 = arith.constant dense<0.000000e+00> : vector<1xf32>
    %15 = vector.multi_reduction <add>, %14, %cst_3 [1, 2] : vector<1x8x1xf32> to vector<1xf32>
    %16 = vector.shape_cast %15 : vector<1xf32> to vector<1x1x1xf32>
    %17 = vector.extract %16[0, 0, 0] : f32 from vector<1x1x1xf32>
    %18 = vector.broadcast %17 : f32 to vector<1x1x128xf32>
    %c0_4 = arith.constant 0 : index
    %c0_5 = arith.constant 0 : index
    %c0_6 = arith.constant 0 : index
    %19 = vector.load %arg2[%c0_4, %c0_5, %c0_6] : memref<1x1x128xf32, #tpu.memory_space<vmem>>, vector<1x1x128xf32>
    tpu.vector_store %arg2[%c0_4, %c0_5, %c0_6], %18 {strides = array<i32>} : memref<1x1x128xf32, #tpu.memory_space<vmem>>, vector<1x1x128xf32>,
    return
  }
  func.func @transform_0(%arg0: i32) -> (i32, i32) {
    %c0_i32 = arith.constant 0 : i32
    %c0_i32_0 = arith.constant 0 : i32
    return %arg0, %c0_i32 : i32, i32
  }
  func.func @transform_1(%arg0: i32) -> (i32, i32, i32) {
    %c0_i32 = arith.constant 0 : i32
    %c0_i32_0 = arith.constant 0 : i32
    %c0_i32_1 = arith.constant 0 : i32
    return %arg0, %c0_i32, %c0_i32_0 : i32, i32, i32
  }
}

</mosaic_0001>

<bundles_post_ra>
// kernel: tpu_custom_call.1
= control target key start
LH: loop header
LB: loop body
LE: loop exit
PB: predicated region body
PF: predicated region fallthrough
CT: control target
= control target key end

     0   :  { %6 = vsyncpa [#allocation3], 0  ;;  %s163_s0 = inlined_call_operand.hbm [shape: f32[8,32], index: 0, kind: input, shape index: {}]   ;;  %s164_s1 = inlined_call_operand.hbm [shape: f32[1,1,128], index: 1, kind: output, shape index: {}]  }
   0x1   :  { %7 = vsyncpa [#allocation4], 0  ;;  %s127_s6 = smov [#allocation2]   ;;  %s79_s10 = scalar_lea.hbm %s163_s0, 128 }
   0x2   :  { %s14_s7 = sshll.u32 %s127_s6, 4  ;;  %p80_p0 = scmp.ne.s32.totalorder %s163_s0, %s79_s10  ;;  %s15_s7 = int_to_ptr.vmem [resolvable:$true] %s14_s7 }
   0x3   :  { %p83_p1 = scmp.lt.u32.totalorder %s79_s10, %s163_s0 }
   0x5   :  { %p85_p2 = pnand %p83_p1, %p80_p0 }
   0x7   :  { %88 = shalt.err (!%p85_p2)
}
   0x8   :  { %s89_s15 = scalar_lea.vmem %s15_s7, 128  ;;  %p94_p4 = scmp.lt.s32.totalorder %s15_s7, %s15_s7 }
   0x9   :  { %p90_p3 = scmp.ne.s32.totalorder %s15_s7, %s89_s15  ;;  %p95_p5 = scmp.lt.s32.totalorder %s89_s15, %s89_s15 }
   0xb   :  { %p96_p6 = por %p95_p5, %p94_p4 }
   0xd   :  { %p97_p7 = pnand %p96_p6, %p90_p3 }
   0xf   :  { %100 = shalt.err (!%p97_p7)
}
  0x10   :  { %17 = dma.hbm_to_vmem [thread:$0]  %s163_s0, 128, %s15_s7, [#allocation3]  }
  0x11   :  { %123 = dma.done.wait [#allocation3], 128  }
  0x12   :  { %124 = vsyncadd [#allocation3], 4294967168  ;;  %vm22_vm0 = vcmask 261120   ;;  %v21_v0 = vld [vmem:[#allocation2] sm:$0xff]  ;;  %vm41_vm1 = vcmask 7168   ;;  %s128_s0 = smov [#allocation5]  }
  0x13   :  { %v23_v1 = vsel %vm22_vm0, %v21_v0, -inf  ;;  %s60_s18 = sshll.u32 %s128_s0, 4  ;;  %s61_s18 = int_to_ptr.vmem [resolvable:$true] %s60_s18 }
  0x14   :  { %24 = vmax.xlane.f32.xlu0 %v23_v1  ;;  %s101_s20 = scalar_lea.vmem %s61_s18, 16  ;;  %s105_s21 = scalar_lea.vmem %s61_s18, 32 }
  0x15   :  { %p102_p8 = scmp.ne.s32.totalorder %s61_s18, %s101_s20  ;;  %p106_p9 = scmp.lt.s32.totalorder %s61_s18, %s61_s18 }
  0x16   :  { %p107_p10 = scmp.lt.s32.totalorder %s105_s21, %s101_s20 }
  0x18   :  { %p108_p11 = por %p107_p10, %p106_p9 }
  0x1a   :  { %p109_p12 = pnand %p108_p11, %p102_p8 }
  0xa1   :  { %v25_v2 = vpop.xlane.xlu0 %24 }
  0xa2   :  { %v26_v3 = vsub.f32 %v21_v0, %v25_v2 }
  0xa4   :  { %v27_v4 = vmul.f32 1.442695, %v26_v3 }
  0xa6   :  { %73 = vpow2.f32 %v27_v4 }
  0xb0   :  { %v74_v5 = vpop.eup %73 }
  0xb1   :  { %v29_v6 = vsel %vm22_vm0, %v74_v5, 0.0  ;;  %v32_v7 = vmul.f32 %v74_v5, %v26_v3 }
  0xb2   :  { %30 = vadd.xlane.f32.xlu0 %v29_v6 }
  0xb3   :  { %v33_v8 = vsel %vm22_vm0, %v32_v7, 0.0 }
  0xb4   :  { %34 = vadd.xlane.f32.xlu1 %v33_v8 }
 0x13f   :  { %v31_v9 = vpop.xlane.xlu0 %30 }
 0x140   :  { %75 = vrcp.f32 %v31_v9 }
 0x141   :  { %77 = vlog2.f32 %v31_v9  ;;  %v35_v11 = vpop.xlane.xlu1 %34 }
 0x14a   :  { %v76_v10 = vpop.eup %75 }
 0x14b   :  { %v78_v12 = vpop.eup %77  ;;  %v37_v13 = vmul.f32 %v76_v10, %v35_v11 }
 0x14c   :  { %v39_v14 = vmul.f32 0.6931472, %v78_v12 }
 0x14e   :  { %v40_v15 = vsub.f32 %v37_v13, %v39_v14 }
 0x150   :  { %v42_v16 = vsel %vm41_vm1, %v40_v15, 0.0 }
 0x151   :  { %43 = vadd.xlane.f32.xlu1 %v42_v16 }
 0x1de   :  { %v44_v17 = vpop.xlane.xlu1 %43 }
 0x1df   :  { %v45_v18 = vrot.slane %v44_v17, 4 }
 0x1e1   :  { %v46_v19 = vadd.f32 %v45_v18, %v44_v17 }
 0x1e3   :  { %v47_v20 = vrot.slane %v46_v19, 2 }
 0x1e5   :  { %v48_v21 = vadd.f32 %v47_v20, %v46_v19 }
 0x1e7   :  { %v49_v22 = vrot.slane %v48_v21, 1 }
 0x1e9   :  { %v50_v23 = vadd.f32 %v49_v22, %v48_v21 }
 0x1eb   :  { %69 = vpush %v50_v23 }
 0x21c   :  { %s70_s19 = spop %69 }
 0x21d   :  { %v52_v24 = vstv %s70_s19 }
 0x21e   :  { %53 = vst [vmem:[#allocation5] sm:$0x1] %v52_v24 }
 0x21f   :  { %112 = shalt.err (!%p109_p12)
}
 0x220   :  { %s113_s24 = scalar_lea.hbm %s164_s1, 16 }
 0x221   :  { %p114_p13 = scmp.ne.s32.totalorder %s164_s1, %s113_s24  ;;  %p117_p0 = scmp.lt.u32.totalorder %s113_s24, %s164_s1 }
 0x223   :  { %p119_p1 = pnand %p117_p0, %p114_p13 }
 0x225   :  { %122 = shalt.err (!%p119_p1)
}
 0x226   :  { %63 = dma.vmem_to_hbm [thread:$0]  %s61_s18, 16, %s164_s1, [#allocation4]  }
 0x227   :  { %125 = dma.done.wait [#allocation4], 16  }
 0x228   :  { %126 = vsyncadd [#allocation4], 4294967280 }
 0x229   :  { %67 = vsyncpa [#allocation3], 1 }
 0x22a   :  { %68 = vsyncpa [#allocation4], 1 }

</bundles_post_ra>
